<compile_context>
chip_gen: v5e
topology: v5e:2x2
jax: 0.10.0
libtpu: 0.0.40
codegen_flags: <defaults>
</compile_context>

<pallas_src>
import jax
import jax.numpy as jnp
from jax.experimental import pallas as pl
from jax.experimental.pallas import tpu as pltpu


def _elu_plus_one(x):
    # F.elu(x) + 1 == where(x > 0, x + 1, exp(x)); clamp the exp argument so
    # the discarded branch can never overflow.
    return jnp.where(x > 0, x + 1.0, jnp.exp(jnp.minimum(x, 0.0)))


def _linear_attention_kernel(x_ref, w_ref, b_ref, o_ref):
    bb, n, d = x_ref.shape            # (block_b, tokens, features)
    mm_dtype = x_ref.dtype            # f32, or bf16 when the wrapper casts inputs
    eps = 1e-6

    # Fused QKV projection: one (bb*n, d) x (d, 3d) MXU matmul, f32 accumulation.
    # The (bb, n, d) -> (bb*n, d) merge is layout-free when n % 8 == 0 and a
    # plain (correct) relayout otherwise.
    x2 = x_ref[...].reshape(bb * n, d)
    qkv = jnp.dot(x2, w_ref[...], preferred_element_type=jnp.float32) + b_ref[...]
    qkv = qkv.reshape(bb, n, 3 * d)
    q = qkv[..., :d]
    k = qkv[..., d:2 * d]
    v = qkv[..., 2 * d:]

    q_p = _elu_plus_one(q)            # (bb, n, d), f32 elementwise on the VPU
    k_p = _elu_plus_one(k)

    # Hoisted MXU-operand casts: once per block (no-ops in the f32 path).
    q_m = q_p.astype(mm_dtype)
    k_m = k_p.astype(mm_dtype)
    v_m = v.astype(mm_dtype)

    if n < d:
        # (Q'K'^T) V ordering: 2*n^2*d MXU flops per batch (vs 2*n*d^2), and
        # the normalization is the row-sum of S (one XLU lane reduce), so the
        # separate k_sum sublane reduce + VPU multiply go away.
        s = jnp.einsum('bnd,bmd->bnm', q_m, k_m,
                       preferred_element_type=jnp.float32)          # (bb, n, n)
        denom = jnp.sum(s, axis=-1, keepdims=True) + eps            # (bb, n, 1)
        num = jnp.einsum('bnm,bme->bne', s.astype(mm_dtype), v_m,
                         preferred_element_type=jnp.float32)        # (bb, n, d)
    else:
        # Q' (K'^T V) ordering: 2*n*d^2 MXU flops per batch; KV contracts over
        # the token axis directly (no explicit transpose).
        kv = jnp.einsum('bnd,bne->bde', k_m, v_m,
                        preferred_element_type=jnp.float32)         # (bb, d, d)
        num = jnp.einsum('bnd,bde->bne', q_m, kv.astype(mm_dtype),
                         preferred_element_type=jnp.float32)        # (bb, n, d)
        k_sum = jnp.sum(k_p, axis=1, keepdims=True)                 # (bb, 1, d)
        denom = jnp.sum(q_p * k_sum, axis=-1, keepdims=True) + eps  # (bb, n, 1)

    # EUP approx reciprocal + one Newton step (near-exact f32, no VPU divide).
    inv = pl.reciprocal(denom, approx=True)
    inv = inv * (2.0 - denom * inv)

    o_ref[...] = (num * inv).astype(o_ref.dtype)


def simple_attention(x, wq, bq, wk, bk, wv, bv, *, block_b=None,
                     use_bf16_matmul=False):
    """x: (B, N, D); w*: (D, D) PyTorch layout (out, in); b*: (D,)."""
    B, N, D = x.shape

    if block_b is None:
        # Aim for ~512-2048 rows per grid step (amortize ~0.35us/step pipeline
        # overhead), capped so the fused qkv f32 intermediate (R x 3D) stays a
        # few MiB and VMEM (32 MiB scoped default; 64 MiB total on v7x) is safe.
        target_rows = max(128, min(2048, (4 << 20) // max(1, 12 * D)))
        block_b = max(1, min(B, target_rows // max(1, N)))
        while B % block_b:
            block_b -= 1
        # v7x megacore: prefer >= 2 grid steps when each step still gets plenty
        # of rows, so both TensorCores are used (no effect on v5e/v6e).
        if B // block_b == 1 and B % 2 == 0 and (B // 2) * N >= 512:
            block_b = B // 2
    assert B % block_b == 0, "block_b must divide B"
    num_blocks = B // block_b

    # Fuse the three projections: x @ W^T + b  ->  x @ [wq^T | wk^T | wv^T].
    w_qkv = jnp.concatenate([wq.T, wk.T, wv.T], axis=1)        # (D, 3D)
    b_qkv = jnp.concatenate([bq, bk, bv]).reshape(1, 3 * D)    # (1, 3D), f32

    x_in = x
    if use_bf16_matmul:
        # v6e / v7x throughput path: bf16 MXU operands (and half the HBM read
        # bytes for x), f32 accumulation; elementwise / EUP math stays f32
        # inside the kernel (v5e-safe).
        x_in = x.astype(jnp.bfloat16)
        w_qkv = w_qkv.astype(jnp.bfloat16)

    # Block shapes keep the full (N, D) / (D, 3D) minor dims, so the (8, 128)
    # divisibility rule is satisfied for every block_b.
    # TODO(synk): for D < 128 the (.., D) loads/stores are lane-masked (32/128
    # lanes here); a lane-dense (B, N*D) out_spec needs an in-kernel
    # sublane->lane relayout plus block_b % 8 == 0, so it is left out at these
    # shapes.  Likewise pipeline_mode=pl.Buffered(1) on the grid-invariant
    # weight/bias and an explicit vmem_limit_bytes only matter for large D on
    # v7x's 64 MiB VMEM.
    out = pl.pallas_call(
        _linear_attention_kernel,
        out_shape=jax.ShapeDtypeStruct((B, N, D), jnp.float32),
        grid_spec=pltpu.PrefetchScalarGridSpec(
            num_scalar_prefetch=0,
            grid=(num_blocks,),
            in_specs=[
                pl.BlockSpec((block_b, N, D), lambda i: (i, 0, 0)),   # activations
                pl.BlockSpec((D, 3 * D), lambda i: (0, 0)),           # fused weight
                pl.BlockSpec((1, 3 * D), lambda i: (0, 0)),           # fused bias
            ],
            out_specs=pl.BlockSpec((block_b, N, D), lambda i: (i, 0, 0)),
        ),
        compiler_params=pltpu.CompilerParams(
            dimension_semantics=("parallel",)),
    )(x_in, w_qkv, b_qkv)
    return out


def simple_attention_ref(x, wq, bq, wk, bk, wv, bv):
    q = x @ wq.T + bq
    k = x @ wk.T + bk
    v = x @ wv.T + bv
    qp = jnp.where(q > 0, q + 1.0, jnp.exp(q))
    kp = jnp.where(k > 0, k + 1.0, jnp.exp(k))
    kv = jnp.einsum('bnd,bne->bde', kp, v)
    num = jnp.einsum('bnd,bde->bne', qp, kv)
    ksum = kp.sum(axis=1)
    norm = jnp.einsum('bnd,bd->bn', qp, ksum)[..., None]
    return num / (norm + 1e-6)


if __name__ == "__main__":
    B, N, D = 2, 8, 32
    key = jax.random.PRNGKey(0)
    kx, kwq, kbq, kwk, kbk, kwv, kbv = jax.random.split(key, 7)

    x = jax.random.normal(kx, (B, N, D), dtype=jnp.float32)
    # Deterministic PyTorch-Linear-like init: U(-1/sqrt(D), 1/sqrt(D)).
    bound = 1.0 / (D ** 0.5)
    init = lambda k, s: jax.random.uniform(k, s, jnp.float32, -bound, bound)
    wq, bq = init(kwq, (D, D)), init(kbq, (D,))
    wk, bk = init(kwk, (D, D)), init(kbk, (D,))
    wv, bv = init(kwv, (D, D)), init(kbv, (D,))

    ref = simple_attention_ref(x, wq, bq, wk, bk, wv, bv)

    # f32 path (default), N < D branch, single grid step.
    out = jax.block_until_ready(simple_attention(x, wq, bq, wk, bk, wv, bv))
    assert out.shape == (B, N, D)
    assert jnp.allclose(out, ref, atol=1e-4, rtol=1e-4), "f32 mismatch vs reference"

    # bf16 MXU-operand path (v6e/v7x throughput suggestion); looser tolerance.
    out_bf16 = jax.block_until_ready(
        simple_attention(x, wq, bq, wk, bk, wv, bv, use_bf16_matmul=True))
    assert jnp.allclose(out_bf16, ref, atol=5e-2, rtol=5e-2), "bf16 mismatch vs reference"

    # Multi-grid-step + N >= D (KV-ordering) branch coverage at small shapes.
    B2, N2, D2 = 4, 64, 32
    kx2 = jax.random.split(key, 8)[-1]
    x2 = jax.random.normal(kx2, (B2, N2, D2), dtype=jnp.float32)
    ref2 = simple_attention_ref(x2, wq, bq, wk, bk, wv, bv)
    out2 = jax.block_until_ready(
        simple_attention(x2, wq, bq, wk, bk, wv, bv, block_b=2))
    assert jnp.allclose(out2, ref2, atol=1e-4, rtol=1e-4), "multi-block mismatch"

    print("KERNEL_OK")
</pallas_src>

<mosaic_0001>
module attributes {stable_mosaic.version = 11 : i64} {
  func.func @_linear_attention_kernel(%arg0: i32, %arg1: memref<2x8x32xf32, #tpu.memory_space<vmem>>, %arg2: memref<32x96xf32, #tpu.memory_space<vmem>>, %arg3: memref<1x96xf32, #tpu.memory_space<vmem>>, %arg4: memref<2x8x32xf32, #tpu.memory_space<vmem>>) attributes {dimension_semantics = [#tpu.dimension_semantics<parallel>], iteration_bounds = array<i64: 1>, scalar_prefetch = 0 : i64, scratch_operands = 0 : i64, tpu.core_type = #tpu.core_type<tc>, window_params = [{transform_indices = @transform_0, window_bounds = array<i64: 2, 8, 32>}, {pipeline_mode = #tpu.pipeline_mode<synchronous>, transform_indices = @transform_1, window_bounds = array<i64: 32, 96>}, {pipeline_mode = #tpu.pipeline_mode<synchronous>, transform_indices = @transform_2, window_bounds = array<i64: 1, 96>}, {transform_indices = @transform_3, window_bounds = array<i64: 2, 8, 32>}]} {
    %c0 = arith.constant 0 : index
    %c0_0 = arith.constant 0 : index
    %c0_1 = arith.constant 0 : index
    %0 = vector.load %arg1[%c0, %c0_0, %c0_1] : memref<2x8x32xf32, #tpu.memory_space<vmem>>, vector<2x8x32xf32>
    %1 = vector.shape_cast %0 : vector<2x8x32xf32> to vector<16x32xf32>
    %c0_2 = arith.constant 0 : index
    %c0_3 = arith.constant 0 : index
    %2 = vector.load %arg2[%c0_2, %c0_3] : memref<32x96xf32, #tpu.memory_space<vmem>>, vector<32x96xf32>
    %cst = arith.constant dense<0.000000e+00> : vector<16x96xf32>
    %3 = tpu.matmul %1, %2, %cst {dimension_numbers = #tpu.dot_dimension_numbers<[1], [0], [0], [1], [0, 0, 1, 1], [], []>} : vector<16x32xf32>, vector<32x96xf32>, vector<16x96xf32> -> vector<16x96xf32>
    %c0_4 = arith.constant 0 : index
    %c0_5 = arith.constant 0 : index
    %4 = vector.load %arg3[%c0_4, %c0_5] : memref<1x96xf32, #tpu.memory_space<vmem>>, vector<1x96xf32>
    %5 = vector.broadcast %4 : vector<1x96xf32> to vector<16x96xf32>
    %6 = arith.addf %3, %5 : vector<16x96xf32>
    %7 = vector.shape_cast %6 : vector<16x96xf32> to vector<2x8x96xf32>
    %8 = vector.extract_strided_slice %7 {offsets = [0, 0, 0], sizes = [2, 8, 32], strides = [1, 1, 1]} : vector<2x8x96xf32> to vector<2x8x32xf32>
    %9 = vector.extract_strided_slice %7 {offsets = [0, 0, 32], sizes = [2, 8, 32], strides = [1, 1, 1]} : vector<2x8x96xf32> to vector<2x8x32xf32>
    %10 = vector.extract_strided_slice %7 {offsets = [0, 0, 64], sizes = [2, 8, 32], strides = [1, 1, 1]} : vector<2x8x96xf32> to vector<2x8x32xf32>
    %cst_6 = arith.constant 0.000000e+00 : f32
    %11 = vector.broadcast %cst_6 : f32 to vector<2x8x32xf32>
    %12 = arith.cmpf ogt, %8, %11 : vector<2x8x32xf32>
    %cst_7 = arith.constant 1.000000e+00 : f32
    %13 = vector.broadcast %cst_7 : f32 to vector<2x8x32xf32>
    %14 = arith.addf %8, %13 : vector<2x8x32xf32>
    %cst_8 = arith.constant 0.000000e+00 : f32
    %15 = vector.broadcast %cst_8 : f32 to vector<2x8x32xf32>
    %16 = arith.minimumf %8, %15 : vector<2x8x32xf32>
    %17 = math.exp %16 : vector<2x8x32xf32>
    %18 = arith.select %12, %14, %17 : vector<2x8x32xi1>, vector<2x8x32xf32>
    %cst_9 = arith.constant 0.000000e+00 : f32
    %19 = vector.broadcast %cst_9 : f32 to vector<2x8x32xf32>
    %20 = arith.cmpf ogt, %9, %19 : vector<2x8x32xf32>
    %cst_10 = arith.constant 1.000000e+00 : f32
    %21 = vector.broadcast %cst_10 : f32 to vector<2x8x32xf32>
    %22 = arith.addf %9, %21 : vector<2x8x32xf32>
    %cst_11 = arith.constant 0.000000e+00 : f32
    %23 = vector.broadcast %cst_11 : f32 to vector<2x8x32xf32>
    %24 = arith.minimumf %9, %23 : vector<2x8x32xf32>
    %25 = math.exp %24 : vector<2x8x32xf32>
    %26 = arith.select %20, %22, %25 : vector<2x8x32xi1>, vector<2x8x32xf32>
    "tpu.trace_start"() <{level = 10 : i32, message = "bnd,bmd->bnm"}> : () -> ()
    %cst_12 = arith.constant dense<0.000000e+00> : vector<2x8x8xf32>
    %27 = tpu.matmul %18, %26, %cst_12 {dimension_numbers = #tpu.dot_dimension_numbers<[2], [2], [1], [1], [0, 0, 0, 1, 1, 1], [0], [0]>} : vector<2x8x32xf32>, vector<2x8x32xf32>, vector<2x8x8xf32> -> vector<2x8x8xf32>
    "tpu.trace_stop"() : () -> ()
    %cst_13 = arith.constant dense<0.000000e+00> : vector<2x8xf32>
    %28 = vector.multi_reduction <add>, %27, %cst_13 [2] : vector<2x8x8xf32> to vector<2x8xf32>
    %29 = vector.shape_cast %28 : vector<2x8xf32> to vector<2x8x1xf32>
    %cst_14 = arith.constant 9.99999997E-7 : f32
    %30 = vector.broadcast %cst_14 : f32 to vector<2x8x1xf32>
    %31 = arith.addf %29, %30 : vector<2x8x1xf32>
    "tpu.trace_start"() <{level = 10 : i32, message = "bnm,bme->bne"}> : () -> ()
    %cst_15 = arith.constant dense<0.000000e+00> : vector<2x8x32xf32>
    %32 = tpu.matmul %27, %10, %cst_15 {dimension_numbers = #tpu.dot_dimension_numbers<[2], [1], [1], [2], [0, 0, 0, 1, 1, 2], [0], [0]>} : vector<2x8x8xf32>, vector<2x8x32xf32>, vector<2x8x32xf32> -> vector<2x8x32xf32>
    "tpu.trace_stop"() : () -> ()
    %33 = tpu.reciprocal %31 {approx = true} : vector<2x8x1xf32> -> vector<2x8x1xf32>
    %34 = arith.mulf %31, %33 : vector<2x8x1xf32>
    %cst_16 = arith.constant 2.000000e+00 : f32
    %35 = vector.broadcast %cst_16 : f32 to vector<2x8x1xf32>
    %36 = arith.subf %35, %34 : vector<2x8x1xf32>
    %37 = arith.mulf %33, %36 : vector<2x8x1xf32>
    %38 = vector.broadcast %37 : vector<2x8x1xf32> to vector<2x8x32xf32>
    %39 = arith.mulf %32, %38 : vector<2x8x32xf32>
    %c0_17 = arith.constant 0 : index
    %c0_18 = arith.constant 0 : index
    %c0_19 = arith.constant 0 : index
    %40 = vector.load %arg4[%c0_17, %c0_18, %c0_19] : memref<2x8x32xf32, #tpu.memory_space<vmem>>, vector<2x8x32xf32>
    tpu.vector_store %arg4[%c0_17, %c0_18, %c0_19], %39 {strides = array<i32>} : memref<2x8x32xf32, #tpu.memory_space<vmem>>, vector<2x8x32xf32>,
    return
  }
  func.func @transform_0(%arg0: i32) -> (i32, i32, i32) {
    %c0_i32 = arith.constant 0 : i32
    %c0_i32_0 = arith.constant 0 : i32
    %c0_i32_1 = arith.constant 0 : i32
    return %arg0, %c0_i32, %c0_i32_0 : i32, i32, i32
  }
  func.func @transform_1(%arg0: i32) -> (i32, i32) {
    %c0_i32 = arith.constant 0 : i32
    %c0_i32_0 = arith.constant 0 : i32
    %c0_i32_1 = arith.constant 0 : i32
    return %c0_i32, %c0_i32_0 : i32, i32
  }
  func.func @transform_2(%arg0: i32) -> (i32, i32) {
    %c0_i32 = arith.constant 0 : i32
    %c0_i32_0 = arith.constant 0 : i32
    %c0_i32_1 = arith.constant 0 : i32
    return %c0_i32, %c0_i32_0 : i32, i32
  }
  func.func @transform_3(%arg0: i32) -> (i32, i32, i32) {
    %c0_i32 = arith.constant 0 : i32
    %c0_i32_0 = arith.constant 0 : i32
    %c0_i32_1 = arith.constant 0 : i32
    return %arg0, %c0_i32, %c0_i32_0 : i32, i32, i32
  }
}

</mosaic_0001>

<bundles_post_ra>
// kernel: tpu_custom_call.1
= control target key start
LH: loop header
LB: loop body
LE: loop exit
PB: predicated region body
PF: predicated region fallthrough
CT: control target
= control target key end

     0   :  { %8 = vsyncpa [#allocation3], 0  ;;  %s406_s0 = inlined_call_operand.hbm [shape: f32[2,8,32], index: 0, kind: input, shape index: {}]   ;;  %s407_s1 = inlined_call_operand.hbm [shape: f32[32,96], index: 1, kind: input, shape index: {}]   ;;  %s408_s2 = inlined_call_operand.vmem [shape: f32[1,96], index: 2, kind: input, shape index: {}]   ;;  %s409_s3 = inlined_call_operand.hbm [shape: f32[2,8,32], index: 3, kind: output, shape index: {}]  }
   0x1   :  { %9 = vsyncpa [#allocation6], 0 }
   0x2   :  { %10 = vsyncpa [#allocation4], 0  ;;  %s15_s14 = sshll.u32 %s406_s0, 4  ;;  %s350_s15 = smov [#allocation2]   ;;  %s16_s14 = int_to_ptr.hbm [resolvable:$true] %s15_s14 }
   0x3   :  { %s17_s16 = sshll.u32 %s350_s15, 4  ;;  %s28_s19 = sshll.u32 %s407_s1, 4  ;;  %s18_s16 = int_to_ptr.vmem [resolvable:$true] %s17_s16  ;;  %s29_s19 = int_to_ptr.hbm [resolvable:$true] %s28_s19 }
   0x4   :  { %s351_s20 = smov 128   ;;  %s352_s21 = smov 8  }
   0x5   :  { %23 = dma.hbm_to_vmem [thread:$0]  %s16_s14, 256, %s18_s16, [#allocation3], %s351_s20, %s351_s20, %s352_s21  }
   0x6   :  { %s353_s22 = smov [#allocation5]  }
   0x7   :  { %s30_s23 = sshll.u32 %s353_s22, 4  ;;  %s31_s23 = int_to_ptr.vmem [resolvable:$true] %s30_s23 }
   0x8   :  { %36 = dma.hbm_to_vmem [thread:$0]  %s29_s19, 512, %s31_s23, [#allocation6], %s351_s20, %s351_s20, %s352_s21  }
   0x9   :  { %344 = dma.done.wait [#allocation3], 256  }
   0xa   :  { %345 = vsyncadd [#allocation3], 4294967040 }
   0xb   :  { %346 = dma.done.wait [#allocation6], 512  }
   0xc   :  { %347 = vsyncadd [#allocation6], 4294966784  ;;  %v52_v0 = vld [vmem:[#allocation5 + $0x18] sm:$0xff]  ;;  %v51_v1 = vld [vmem:[#allocation5 + $0x10] sm:$0xff]  ;;  %vm57_vm0 = vcmask 261120   ;;  %s354_s24 = smov 64  }
   0xd   :  { %76 = vmatpush.msra.mxu0 %v52_v0  ;;  %v50_v2 = vld [vmem:[#allocation5 + $0x8] sm:$0xff]  ;;  %v49_v3 = vld [vmem:[#allocation5] sm:$0xff]  ;;  %v47_v4 = vld [vmem:[#allocation2] sm:$0xff]  ;;  %s355_s25 = smov 96   ;;  %vm153_vm3 = vcmask 64512   ;;  %s234_s29 = sshll.u32 %s409_s3, 4  ;;  %s235_s29 = int_to_ptr.hbm [resolvable:$true] %s234_s29 }
   0xe   :  { %v48_v5 = vld [vmem:[#allocation2 + $0x8] sm:$0xff]  ;;  %v263_v6 = vld [vmem:[%s408_s2] ss:$0 sm:$0xff]  ;;  %s356_s2 = smov [#allocation7]  }
   0xf   :  { %77 = vmatpush.msra.mxu0 %v51_v1  ;;  %s232_s26 = sshll.u32 %s356_s2, 4  ;;  %s233_s26 = int_to_ptr.vmem [resolvable:$true] %s232_s26 }
  0x11   :  { %78 = vmatpush.msra.mxu0 %v50_v2 }
  0x13   :  { %79 = vmatpush.msra.mxu0 %v49_v3 }
  0x14   :  { %248 = vmatmul.msk.f32.vlgmr.msra.gmra.mxu0 %vm57_vm0, %v47_v4 }
  0x1c   :  { %249 = vmatmul.msk.f32.gmra.mxu0 %vm57_vm0, %v48_v5 }
  0x91   :  { %v81_v7 = vpop.f32.mrf.mxu0 }
  0x92   :  { %v82_v8 = vadd.f32 %v263_v6, %v81_v7 }
  0x94   :  { %v91_v9 = vmin.f32 %v82_v8, 0.0  ;;  %163 = vrot.lane.b32.xlu1 %v82_v8, %s354_s24  ;;  %v89_v14 = vadd.f32 1.0, %v82_v8  ;;  %vm87_vm1 = vcmp.gt.f32.partialorder %v82_v8, 0.0 }
  0x96   :  { %v93_v10 = vmul.f32 1.442695, %v91_v9 }
  0x98   :  { %264 = vpow2.f32 %v93_v10 }
  0x99   :  { %v84_v11 = vpop.f32.mrf.mxu0 }
  0x9a   :  { %v85_v12 = vadd.f32 %v263_v6, %v84_v11 }
  0x9c   :  { %v92_v13 = vmin.f32 %v85_v12, 0.0  ;;  %190 = vrot.lane.b32.xlu1 %v85_v12, %s354_s24  ;;  %v90_v18 = vadd.f32 1.0, %v85_v12  ;;  %vm88_vm2 = vcmp.gt.f32.partialorder %v85_v12, 0.0 }
  0x9e   :  { %v265_v15 = vpop.eup %264  ;;  %v95_v16 = vmul.f32 1.442695, %v92_v13 }
  0x9f   :  { %v97_v17 = vsel %vm87_vm1, %v89_v14, %v265_v15 }
  0xa0   :  { %266 = vpow2.f32 %v95_v16  ;;  %100 = vrot.lane.b32.xlu0 %v97_v17, %s355_s25 }
  0xa6   :  { %v267_v19 = vpop.eup %266 }
  0xa7   :  { %v98_v20 = vsel %vm88_vm2, %v90_v18, %v267_v19 }
  0xa8   :  { %127 = vrot.lane.b32.xlu0 %v98_v20, %s355_s25 }
 0x106   :  { %v164_v21 = vpop.permute.xlu1 %163 }
 0x107   :  { %184 = vmatpush.msra.mxu3 %v164_v21 }
 0x10e   :  { %v191_v22 = vpop.permute.xlu1 %190 }
 0x10f   :  { %211 = vmatpush.msrb.mxu3 %v191_v22 }
 0x112   :  { %v101_v23 = vpop.permute.xlu0 %100 }
 0x113   :  { %250 = vmatpush.xpose.msk.msra.mxu1 %vm57_vm0, %v101_v23 }
 0x116   :  { %251 = vmatmul.msk.f32.vlgmr.msra.gmra.mxu1 %vm57_vm0, %v97_v17 }
 0x11a   :  { %v128_v24 = vpop.permute.xlu0 %127 }
 0x11b   :  { %252 = vmatpush.xpose.msk.msra.mxu2 %vm57_vm0, %v128_v24 }
 0x11e   :  { %253 = vmatmul.msk.f32.vlgmr.msra.gmra.mxu2 %vm57_vm0, %v98_v20 }
 0x193   :  { %v123_v25 = vpop.f32.mrf.mxu1 }
 0x194   :  { %254 = vmatmul.msk.f32.vlgmr.msra.gmra.mxu3 %vm153_vm3, %v123_v25  ;;  %v154_v26 = vsel %vm153_vm3, %v123_v25, 0.0 }
 0x195   :  { %155 = vadd.xlane.f32.xlu2 %v154_v26 }
 0x1a1   :  { %v150_v27 = vpop.f32.mrf.mxu2 }
 0x1a2   :  { %255 = vmatmul.msk.f32.vlgmr.msrb.gmra.mxu3 %vm153_vm3, %v150_v27  ;;  %v157_v28 = vsel %vm153_vm3, %v150_v27, 0.0 }
 0x1a3   :  { %158 = vadd.xlane.f32.xlu2 %v157_v28 }
 0x208   :  { %v156_v29 = vpop.xlane.xlu2 %155 }
 0x209   :  { %v160_v30 = vadd.f32 1e-06, %v156_v29 }
 0x20b   :  { %268 = vrcp.f32 %v160_v30 }
 0x211   :  { %v269_v31 = vpop.eup %268 }
 0x212   :  { %v218_v32 = vmul.f32 %v269_v31, %v160_v30 }
 0x214   :  { %v220_v33 = vsub.f32 2.0, %v218_v32 }
 0x216   :  { %v159_v34 = vpop.xlane.xlu2 %158  ;;  %v222_v35 = vmul.f32 %v269_v31, %v220_v33 }
 0x217   :  { %v161_v36 = vadd.f32 1e-06, %v159_v34  ;;  %v186_v37 = vpop.f32.mrf.mxu3 }
 0x218   :  { %v224_v38 = vmul.f32 %v222_v35, %v186_v37 }
 0x219   :  { %270 = vrcp.f32 %v161_v36 }
 0x21a   :  { %226 = vst.msk [vmem:[#allocation7] sm:$0xff] %vm57_vm0, %v224_v38 }
 0x21f   :  { %v271_v39 = vpop.eup %270 }
 0x220   :  { %v219_v40 = vmul.f32 %v271_v39, %v161_v36 }
 0x222   :  { %v221_v41 = vsub.f32 2.0, %v219_v40 }
 0x224   :  { %v223_v42 = vmul.f32 %v271_v39, %v221_v41 }
 0x225   :  { %v213_v43 = vpop.f32.mrf.mxu3 }
 0x226   :  { %v225_v44 = vmul.f32 %v223_v42, %v213_v43 }
 0x228   :  { %227 = vst.msk [vmem:[#allocation7 + $0x8] sm:$0xff] %vm57_vm0, %v225_v44 }
 0x229   :  { %240 = dma.vmem_to_hbm [thread:$0]  %s233_s26, 256, %s235_s29, [#allocation4], %s351_s20, %s351_s20, %s352_s21  }
 0x22a   :  { %348 = dma.done.wait [#allocation4], 256  }
 0x22b   :  { %349 = vsyncadd [#allocation4], 4294967040 }
 0x22c   :  { %245 = vsyncpa [#allocation3], 1 }
 0x22d   :  { %246 = vsyncpa [#allocation6], 1 }
 0x22e   :  { %247 = vsyncpa [#allocation4], 1 }

</bundles_post_ra>
